<compile_context>
chip_gen: v6e
topology: v6e:2x2x1
jax: 0.10.0
libtpu: 0.0.40
codegen_flags: <defaults>
</compile_context>

<pallas_src>
import numpy as np
import jax
import jax.numpy as jnp
from jax import lax
from jax.experimental import pallas as pl
from jax.experimental.pallas import tpu as pltpu


def _sep_conv_kernel(xf_ref, xt_ref, wf_ref, wt_ref, wpf_ref, wpt_ref,
                     bf_ref, bt_ref, bp_ref, out_ref):
    # xf_ref / xt_ref : (K*C, TM)  bf16  -- streamed im2col tiles (freq / time taps)
    # wf_ref / wt_ref : (C, K*C)   bf16  -- branch weights^T, BN scale pre-folded
    # wpf_ref/wpt_ref : (Cout, C)  f32   -- 1x1 projection halves^T, BN scale pre-folded
    # b*_ref          : (*, 1)     f32   -- folded BN biases
    # out_ref         : (Cout, TM) f32   -- lane-dense output tile
    ff = jnp.dot(wf_ref[...], xf_ref[...], preferred_element_type=jnp.float32)   # (C, TM)
    ft = jnp.dot(wt_ref[...], xt_ref[...], preferred_element_type=jnp.float32)   # (C, TM)
    ff = jnp.maximum(ff + bf_ref[...], 0.0)                                       # freq: bias+ReLU
    ft = jnp.maximum(ft + bt_ref[...], 0.0)                                       # time: bias+ReLU
    o = (jnp.dot(wpf_ref[...], ff, preferred_element_type=jnp.float32)
         + jnp.dot(wpt_ref[...], ft, preferred_element_type=jnp.float32)
         + bp_ref[...])                                                           # (Cout, TM)
    out_ref[...] = jnp.maximum(o, 0.0)


def _fold_bn(gamma, beta, mean, var, conv_bias, eps=1e-5):
    scale = gamma / jnp.sqrt(var + eps)
    bias = beta + scale * (conv_bias - mean)
    return scale, bias


def _round_up(a, b):
    return -(-a // b) * b


def depthwise_spatially_separable_conv(x_nchw, params, kernel_size, stride, block_m=1024):
    K, s = kernel_size, stride
    N, C, H, W = x_nchw.shape
    Cout = params["wp"].shape[1]

    # intermediate spatial dims (both branches must agree for the channel concat, as in torch)
    H1f, W1f = (H - K) // s + 1, (W - 1) // s + 1
    H1t, W1t = (H - 1) // s + 1, (W - K) // s + 1
    assert (H1f, W1f) == (H1t, W1t), "branch output shapes must match for torch.cat"
    H1, W1 = H1f, W1f
    H2, W2 = (H1 - 1) // s + 1, (W1 - 1) // s + 1
    M = N * H2 * W2
    se = s * s   # composed stride: branch conv (stride s) followed by 1x1 projection (stride s)

    # ---- glue (plain JAX): strided-slice im2col, transposed so M is the lane dimension ----
    x = jnp.transpose(x_nchw, (0, 2, 3, 1))                          # NHWC
    h_hi = (H2 - 1) * se + 1
    w_hi = (W2 - 1) * se + 1
    # freq branch, kernel (K, 1):  x[n, h2*se + kh, w2*se, c]
    freq_taps = [lax.slice(x, (0, kh, 0, 0), (N, kh + h_hi, w_hi, C), (1, se, se, 1))
                 for kh in range(K)]
    # time branch, kernel (1, K):  x[n, h2*se, w2*se + kw, c]
    time_taps = [lax.slice(x, (0, 0, kw, 0), (N, h_hi, kw + w_hi, C), (1, se, se, 1))
                 for kw in range(K)]
    # (K, N, H2, W2, C) -> (K, C, N, H2, W2) -> (K*C, M); row order = (tap, c_in)
    xf_t = jnp.transpose(jnp.stack(freq_taps, 0), (0, 4, 1, 2, 3)).reshape(K * C, M)
    xt_t = jnp.transpose(jnp.stack(time_taps, 0), (0, 4, 1, 2, 3)).reshape(K * C, M)

    # ---- fold eval-mode BN into the matmul weights; only bias + ReLU stays in the kernel ----
    sc_f, bi_f = _fold_bn(params["gamma_f"], params["beta_f"], params["mean_f"],
                          params["var_f"], params["bf"])
    sc_t, bi_t = _fold_bn(params["gamma_t"], params["beta_t"], params["mean_t"],
                          params["var_t"], params["bt"])
    sc_p, bi_p = _fold_bn(params["gamma_p"], params["beta_p"], params["mean_p"],
                          params["var_p"], params["bp"])

    # params["wf"]/["wt"]: (K, C_in, C_out); rows of the reshape = (tap, c_in) -> matches im2col
    wf_T = (params["wf"].reshape(K * C, C) * sc_f[None, :]).T        # (C, K*C)
    wt_T = (params["wt"].reshape(K * C, C) * sc_t[None, :]).T        # (C, K*C)
    wp_scaled = params["wp"] * sc_p[None, :]                         # (2C, Cout), scale folded
    wpf_T = wp_scaled[:C].T                                          # (Cout, C) -- freq half
    wpt_T = wp_scaled[C:].T                                          # (Cout, C) -- time half

    bf_col = bi_f[:, None].astype(jnp.float32)                       # (C, 1)
    bt_col = bi_t[:, None].astype(jnp.float32)                       # (C, 1)
    bp_col = bi_p[:, None].astype(jnp.float32)                       # (Cout, 1)

    # pad M up to a lane-aligned tile multiple; bf16 for streamed operands + branch weights
    TM = min(_round_up(block_m, 128), _round_up(M, 128))
    Mp = _round_up(M, TM)
    xf_t = jnp.pad(xf_t, ((0, 0), (0, Mp - M))).astype(jnp.bfloat16)
    xt_t = jnp.pad(xt_t, ((0, 0), (0, Mp - M))).astype(jnp.bfloat16)
    wf_T = wf_T.astype(jnp.bfloat16)
    wt_T = wt_T.astype(jnp.bfloat16)
    wpf_T = wpf_T.astype(jnp.float32)
    wpt_T = wpt_T.astype(jnp.float32)

    out_t = pl.pallas_call(
        _sep_conv_kernel,
        out_shape=jax.ShapeDtypeStruct((Cout, Mp), jnp.float32),
        grid_spec=pltpu.PrefetchScalarGridSpec(
            num_scalar_prefetch=0,
            grid=(Mp // TM,),
            in_specs=[
                pl.BlockSpec((K * C, TM), lambda i: (0, i)),     # streamed freq im2col tile
                pl.BlockSpec((K * C, TM), lambda i: (0, i)),     # streamed time im2col tile
                pl.BlockSpec((C, K * C), lambda i: (0, 0)),      # constant -> VMEM resident
                pl.BlockSpec((C, K * C), lambda i: (0, 0)),
                pl.BlockSpec((Cout, C), lambda i: (0, 0)),
                pl.BlockSpec((Cout, C), lambda i: (0, 0)),
                pl.BlockSpec((C, 1), lambda i: (0, 0)),
                pl.BlockSpec((C, 1), lambda i: (0, 0)),
                pl.BlockSpec((Cout, 1), lambda i: (0, 0)),
            ],
            out_specs=pl.BlockSpec((Cout, TM), lambda i: (0, i)),  # lane-dense output tile
        ),
        compiler_params=pltpu.CompilerParams(
            dimension_semantics=("parallel",),     # shard M across TCs (v7x megacore)
        ),
    )(xf_t, xt_t, wf_T, wt_T, wpf_T, wpt_T, bf_col, bt_col, bp_col)

    out = out_t[:, :M].reshape(Cout, N, H2, W2)
    return jnp.transpose(out, (1, 0, 2, 3))                          # back to NCHW


def _reference(x, params, K, s):
    """Pure-JAX reference mirroring the torch module (eval-mode BN)."""
    eps = 1e-5

    def cbr(x, w_oihw, b, gamma, beta, mean, var, stride):
        y = lax.conv_general_dilated(x, w_oihw, (stride, stride), "VALID",
                                     dimension_numbers=("NCHW", "OIHW", "NCHW"))
        y = y + b[None, :, None, None]
        y = gamma[None, :, None, None] * (y - mean[None, :, None, None]) \
            / jnp.sqrt(var[None, :, None, None] + eps) + beta[None, :, None, None]
        return jnp.maximum(y, 0.0)

    wf_oihw = jnp.transpose(params["wf"], (2, 1, 0))[:, :, :, None]   # (Co, Ci, K, 1)
    wt_oihw = jnp.transpose(params["wt"], (2, 1, 0))[:, :, None, :]   # (Co, Ci, 1, K)
    wp_oihw = params["wp"].T[:, :, None, None]                        # (Co, 2C, 1, 1)
    freq = cbr(x, wf_oihw, params["bf"], params["gamma_f"], params["beta_f"],
               params["mean_f"], params["var_f"], s)
    time = cbr(x, wt_oihw, params["bt"], params["gamma_t"], params["beta_t"],
               params["mean_t"], params["var_t"], s)
    cat = jnp.concatenate([freq, time], axis=1)
    return cbr(cat, wp_oihw, params["bp"], params["gamma_p"], params["beta_p"],
               params["mean_p"], params["var_p"], s)


if __name__ == "__main__":
    N, C, H, W = 2, 4, 16, 16
    Cout, K, s = 8, 2, 2                               # kernel_size=(2,2), stride=2

    key = jax.random.PRNGKey(0)
    keys = jax.random.split(key, 19)

    def nrm(k, shape, scale=0.1):
        return scale * jax.random.normal(k, shape, jnp.float32)

    params = dict(
        wf=nrm(keys[0], (K, C, C)), bf=nrm(keys[1], (C,)),
        gamma_f=1.0 + nrm(keys[2], (C,)), beta_f=nrm(keys[3], (C,)),
        mean_f=nrm(keys[4], (C,)), var_f=0.5 + jnp.abs(nrm(keys[5], (C,))),
        wt=nrm(keys[6], (K, C, C)), bt=nrm(keys[7], (C,)),
        gamma_t=1.0 + nrm(keys[8], (C,)), beta_t=nrm(keys[9], (C,)),
        mean_t=nrm(keys[10], (C,)), var_t=0.5 + jnp.abs(nrm(keys[11], (C,))),
        wp=nrm(keys[12], (2 * C, Cout)), bp=nrm(keys[13], (Cout,)),
        gamma_p=1.0 + nrm(keys[14], (Cout,)), beta_p=nrm(keys[15], (Cout,)),
        mean_p=nrm(keys[16], (Cout,)), var_p=0.5 + jnp.abs(nrm(keys[17], (Cout,))),
    )
    x = jax.random.normal(keys[18], (N, C, H, W), jnp.float32)

    out = depthwise_spatially_separable_conv(x, params, kernel_size=K, stride=s)
    out = jax.block_until_ready(out)

    ref = _reference(x, params, K, s)
    assert out.shape == ref.shape, (out.shape, ref.shape)
    # bf16 streamed operands / branch weights -> bf16-level tolerance (f32 accumulation + epilogue)
    np.testing.assert_allclose(np.asarray(out), np.asarray(ref), atol=1e-2, rtol=1e-2)
    print("KERNEL_OK")
</pallas_src>

<mosaic_0001>
module attributes {stable_mosaic.version = 11 : i64} {
  func.func @_sep_conv_kernel(%arg0: i32, %arg1: memref<8x128xbf16, #tpu.memory_space<vmem>>, %arg2: memref<8x128xbf16, #tpu.memory_space<vmem>>, %arg3: memref<4x8xbf16, #tpu.memory_space<vmem>>, %arg4: memref<4x8xbf16, #tpu.memory_space<vmem>>, %arg5: memref<8x4xf32, #tpu.memory_space<vmem>>, %arg6: memref<8x4xf32, #tpu.memory_space<vmem>>, %arg7: memref<4x1xf32, #tpu.memory_space<vmem>>, %arg8: memref<4x1xf32, #tpu.memory_space<vmem>>, %arg9: memref<8x1xf32, #tpu.memory_space<vmem>>, %arg10: memref<8x128xf32, #tpu.memory_space<vmem>>) attributes {dimension_semantics = [#tpu.dimension_semantics<parallel>], iteration_bounds = array<i64: 1>, scalar_prefetch = 0 : i64, scratch_operands = 0 : i64, tpu.core_type = #tpu.core_type<tc>, window_params = [{transform_indices = @transform_0, window_bounds = array<i64: 8, 128>}, {transform_indices = @transform_1, window_bounds = array<i64: 8, 128>}, {pipeline_mode = #tpu.pipeline_mode<synchronous>, transform_indices = @transform_2, window_bounds = array<i64: 4, 8>}, {pipeline_mode = #tpu.pipeline_mode<synchronous>, transform_indices = @transform_3, window_bounds = array<i64: 4, 8>}, {pipeline_mode = #tpu.pipeline_mode<synchronous>, transform_indices = @transform_4, window_bounds = array<i64: 8, 4>}, {pipeline_mode = #tpu.pipeline_mode<synchronous>, transform_indices = @transform_5, window_bounds = array<i64: 8, 4>}, {pipeline_mode = #tpu.pipeline_mode<synchronous>, transform_indices = @transform_6, window_bounds = array<i64: 4, 1>}, {pipeline_mode = #tpu.pipeline_mode<synchronous>, transform_indices = @transform_7, window_bounds = array<i64: 4, 1>}, {pipeline_mode = #tpu.pipeline_mode<synchronous>, transform_indices = @transform_8, window_bounds = array<i64: 8, 1>}, {transform_indices = @transform_9, window_bounds = array<i64: 8, 128>}]} {
    %c0 = arith.constant 0 : index
    %c0_0 = arith.constant 0 : index
    %0 = vector.load %arg3[%c0, %c0_0] : memref<4x8xbf16, #tpu.memory_space<vmem>>, vector<4x8xbf16>
    %c0_1 = arith.constant 0 : index
    %c0_2 = arith.constant 0 : index
    %1 = vector.load %arg1[%c0_1, %c0_2] : memref<8x128xbf16, #tpu.memory_space<vmem>>, vector<8x128xbf16>
    %cst = arith.constant dense<0.000000e+00> : vector<4x128xf32>
    %2 = tpu.matmul %0, %1, %cst {dimension_numbers = #tpu.dot_dimension_numbers<[1], [0], [0], [1], [0, 0, 1, 1], [], []>} : vector<4x8xbf16>, vector<8x128xbf16>, vector<4x128xf32> -> vector<4x128xf32>
    %c0_3 = arith.constant 0 : index
    %c0_4 = arith.constant 0 : index
    %3 = vector.load %arg4[%c0_3, %c0_4] : memref<4x8xbf16, #tpu.memory_space<vmem>>, vector<4x8xbf16>
    %c0_5 = arith.constant 0 : index
    %c0_6 = arith.constant 0 : index
    %4 = vector.load %arg2[%c0_5, %c0_6] : memref<8x128xbf16, #tpu.memory_space<vmem>>, vector<8x128xbf16>
    %cst_7 = arith.constant dense<0.000000e+00> : vector<4x128xf32>
    %5 = tpu.matmul %3, %4, %cst_7 {dimension_numbers = #tpu.dot_dimension_numbers<[1], [0], [0], [1], [0, 0, 1, 1], [], []>} : vector<4x8xbf16>, vector<8x128xbf16>, vector<4x128xf32> -> vector<4x128xf32>
    %c0_8 = arith.constant 0 : index
    %c0_9 = arith.constant 0 : index
    %6 = vector.load %arg7[%c0_8, %c0_9] : memref<4x1xf32, #tpu.memory_space<vmem>>, vector<4x1xf32>
    %7 = vector.broadcast %6 : vector<4x1xf32> to vector<4x128xf32>
    %8 = arith.addf %2, %7 : vector<4x128xf32>
    %cst_10 = arith.constant 0.000000e+00 : f32
    %9 = vector.broadcast %cst_10 : f32 to vector<4x128xf32>
    %10 = arith.maximumf %8, %9 : vector<4x128xf32>
    %c0_11 = arith.constant 0 : index
    %c0_12 = arith.constant 0 : index
    %11 = vector.load %arg8[%c0_11, %c0_12] : memref<4x1xf32, #tpu.memory_space<vmem>>, vector<4x1xf32>
    %12 = vector.broadcast %11 : vector<4x1xf32> to vector<4x128xf32>
    %13 = arith.addf %5, %12 : vector<4x128xf32>
    %cst_13 = arith.constant 0.000000e+00 : f32
    %14 = vector.broadcast %cst_13 : f32 to vector<4x128xf32>
    %15 = arith.maximumf %13, %14 : vector<4x128xf32>
    %c0_14 = arith.constant 0 : index
    %c0_15 = arith.constant 0 : index
    %16 = vector.load %arg5[%c0_14, %c0_15] : memref<8x4xf32, #tpu.memory_space<vmem>>, vector<8x4xf32>
    %cst_16 = arith.constant dense<0.000000e+00> : vector<8x128xf32>
    %17 = tpu.matmul %16, %10, %cst_16 {dimension_numbers = #tpu.dot_dimension_numbers<[1], [0], [0], [1], [0, 0, 1, 1], [], []>} : vector<8x4xf32>, vector<4x128xf32>, vector<8x128xf32> -> vector<8x128xf32>
    %c0_17 = arith.constant 0 : index
    %c0_18 = arith.constant 0 : index
    %18 = vector.load %arg6[%c0_17, %c0_18] : memref<8x4xf32, #tpu.memory_space<vmem>>, vector<8x4xf32>
    %cst_19 = arith.constant dense<0.000000e+00> : vector<8x128xf32>
    %19 = tpu.matmul %18, %15, %cst_19 {dimension_numbers = #tpu.dot_dimension_numbers<[1], [0], [0], [1], [0, 0, 1, 1], [], []>} : vector<8x4xf32>, vector<4x128xf32>, vector<8x128xf32> -> vector<8x128xf32>
    %20 = arith.addf %17, %19 : vector<8x128xf32>
    %c0_20 = arith.constant 0 : index
    %c0_21 = arith.constant 0 : index
    %21 = vector.load %arg9[%c0_20, %c0_21] : memref<8x1xf32, #tpu.memory_space<vmem>>, vector<8x1xf32>
    %22 = vector.broadcast %21 : vector<8x1xf32> to vector<8x128xf32>
    %23 = arith.addf %20, %22 : vector<8x128xf32>
    %cst_22 = arith.constant 0.000000e+00 : f32
    %24 = vector.broadcast %cst_22 : f32 to vector<8x128xf32>
    %25 = arith.maximumf %23, %24 : vector<8x128xf32>
    %c0_23 = arith.constant 0 : index
    %c0_24 = arith.constant 0 : index
    %26 = vector.load %arg10[%c0_23, %c0_24] : memref<8x128xf32, #tpu.memory_space<vmem>>, vector<8x128xf32>
    tpu.vector_store %arg10[%c0_23, %c0_24], %25 {strides = array<i32>} : memref<8x128xf32, #tpu.memory_space<vmem>>, vector<8x128xf32>,
    return
  }
  func.func @transform_0(%arg0: i32) -> (i32, i32) {
    %c0_i32 = arith.constant 0 : i32
    %c0_i32_0 = arith.constant 0 : i32
    return %c0_i32, %arg0 : i32, i32
  }
  func.func @transform_1(%arg0: i32) -> (i32, i32) {
    %c0_i32 = arith.constant 0 : i32
    %c0_i32_0 = arith.constant 0 : i32
    return %c0_i32, %arg0 : i32, i32
  }
  func.func @transform_2(%arg0: i32) -> (i32, i32) {
    %c0_i32 = arith.constant 0 : i32
    %c0_i32_0 = arith.constant 0 : i32
    %c0_i32_1 = arith.constant 0 : i32
    return %c0_i32, %c0_i32_0 : i32, i32
  }
  func.func @transform_3(%arg0: i32) -> (i32, i32) {
    %c0_i32 = arith.constant 0 : i32
    %c0_i32_0 = arith.constant 0 : i32
    %c0_i32_1 = arith.constant 0 : i32
    return %c0_i32, %c0_i32_0 : i32, i32
  }
  func.func @transform_4(%arg0: i32) -> (i32, i32) {
    %c0_i32 = arith.constant 0 : i32
    %c0_i32_0 = arith.constant 0 : i32
    %c0_i32_1 = arith.constant 0 : i32
    return %c0_i32, %c0_i32_0 : i32, i32
  }
  func.func @transform_5(%arg0: i32) -> (i32, i32) {
    %c0_i32 = arith.constant 0 : i32
    %c0_i32_0 = arith.constant 0 : i32
    %c0_i32_1 = arith.constant 0 : i32
    return %c0_i32, %c0_i32_0 : i32, i32
  }
  func.func @transform_6(%arg0: i32) -> (i32, i32) {
    %c0_i32 = arith.constant 0 : i32
    %c0_i32_0 = arith.constant 0 : i32
    %c0_i32_1 = arith.constant 0 : i32
    return %c0_i32, %c0_i32_0 : i32, i32
  }
  func.func @transform_7(%arg0: i32) -> (i32, i32) {
    %c0_i32 = arith.constant 0 : i32
    %c0_i32_0 = arith.constant 0 : i32
    %c0_i32_1 = arith.constant 0 : i32
    return %c0_i32, %c0_i32_0 : i32, i32
  }
  func.func @transform_8(%arg0: i32) -> (i32, i32) {
    %c0_i32 = arith.constant 0 : i32
    %c0_i32_0 = arith.constant 0 : i32
    %c0_i32_1 = arith.constant 0 : i32
    return %c0_i32, %c0_i32_0 : i32, i32
  }
  func.func @transform_9(%arg0: i32) -> (i32, i32) {
    %c0_i32 = arith.constant 0 : i32
    %c0_i32_0 = arith.constant 0 : i32
    return %c0_i32, %arg0 : i32, i32
  }
}

</mosaic_0001>

<bundles_post_ra>
// kernel: tpu_custom_call.1
= control target key start
LH: loop header
LB: loop body
LE: loop exit
PB: predicated region body
PF: predicated region fallthrough
CT: control target
= control target key end

     0   :  { %vm48_vm0 = vcmask 1043456   ;;  %v388_v2 = vmov 0.0   ;;  %vm44_vm1 = vcmask 64512   ;;  %vm389_vm2 = vmmov 0   ;;  %s476_s0 = inlined_call_operand.vmem [shape: bf16[8,128], index: 0, kind: input, shape index: {}]   ;;  %s477_s1 = inlined_call_operand.vmem [shape: bf16[8,128], index: 1, kind: input, shape index: {}]   ;;  %s478_s2 = inlined_call_operand.vmem [shape: bf16[4,8], index: 2, kind: input, shape index: {}]   ;;  %s479_s3 = inlined_call_operand.vmem [shape: bf16[4,8], index: 3, kind: input, shape index: {}]   ;;  %s480_s4 = inlined_call_operand.vmem [shape: f32[8,4], index: 4, kind: input, shape index: {}]   ;;  %s481_s5 = inlined_call_operand.vmem [shape: f32[8,4], index: 5, kind: input, shape index: {}]   ;;  %s482_s6 = inlined_call_operand.vmem [shape: f32[4,1], index: 6, kind: input, shape index: {}]   ;;  %s483_s7 = inlined_call_operand.vmem [shape: f32[4,1], index: 7, kind: input, shape index: {}]   ;;  %s484_s8 = inlined_call_operand.vmem [shape: f32[8,1], index: 8, kind: input, shape index: {}]   ;;  %s485_s9 = inlined_call_operand.hbm [shape: f32[8,128], index: 9, kind: output, shape index: {}]  }
   0x1   :  { %v35_v0 = vld [vmem:[%s476_s0] sm:$0xf]  ;;  %338 = vmatprep.subr.bf16.mxu0 %v388_v2  ;;  %344 = vmatprep.subr.bf16.mxu1 %v388_v2 }
   0x2   :  { %v37_v1 = vld [vmem:[%s477_s1] sm:$0xf]  ;;  %v50_v3 = vsel %vm48_vm0, %v35_v0, 0  ;;  %340 = vmatprep.mubr.msk.bf16.mxu0 %vm389_vm2, %v388_v2  ;;  %346 = vmatprep.mubr.msk.bf16.mxu1 %vm389_vm2, %v388_v2 }
   0x3   :  { %v103_v4 = vsel %vm48_vm0, %v37_v1, 0  ;;  %339 = vmatpush3.bf16.msra.mxu0 %v50_v3  ;;  %v34_v5 = vld [vmem:[%s478_s2] sm:$0x3] }
   0x4   :  { %345 = vmatpush3.bf16.msra.mxu1 %v103_v4  ;;  %v36_v6 = vld [vmem:[%s479_s3] sm:$0x3] }
   0x5   :  { %v38_v7 = vld [vmem:[%s482_s6] sm:$0xf] }
   0x6   :  { %14 = vsyncpa [#allocation3], 0  ;;  %v390_v8 = vmov 0   ;;  %350 = vmatprep.subr.mxu0 %v388_v2  ;;  %341 = vmatmul.mubr.msk.bf16.vlgmr.msra.gmra.mxu0 %vm44_vm1, %v34_v5  ;;  %v93_v9 = vld [vmem:[%s483_s7] sm:$0xf]  ;;  %vm148_vm3 = vcmask 31744  }
   0x7   :  { %364 = vset.pattern.permute.xlu0 %v390_v8  ;;  %347 = vmatmul.mubr.msk.bf16.vlgmr.msra.gmra.mxu1 %vm44_vm1, %v36_v6  ;;  %v301_v10 = vld [vmem:[%s484_s8] sm:$0xff] }
   0x8   :  { %41 = vperm.xlu0 %364, %v38_v7   ;;  %355 = vmatprep.subr.mxu1 %v388_v2  ;;  %v147_v21 = vld [vmem:[%s481_s5] sm:$0xff]  ;;  %s391_s5 = smov [#allocation2]  }
   0x9   :  { %352 = vmatprep.mubr.msk.f32.mxu0 %vm389_vm2, %v388_v2  ;;  %357 = vmatprep.mubr.msk.f32.mxu1 %vm389_vm2, %v388_v2  ;;  %v146_v22 = vld [vmem:[%s480_s4] sm:$0xff]  ;;  %s316_s8 = sshll.u32 %s391_s5, 4  ;;  %s317_s8 = int_to_ptr.vmem [resolvable:$true] %s316_s8 }
   0xa   :  { %365 = vset.pattern.permute.xlu1 %v390_v8  ;;  %s366_s4 = scalar_lea.vmem %s317_s8, 128  ;;  %p371_p1 = scmp.lt.s32.totalorder %s317_s8, %s317_s8 }
   0xb   :  { %304 = vperm.xlu1 %365, %v301_v10   ;;  %p367_p0 = scmp.ne.s32.totalorder %s317_s8, %s366_s4  ;;  %p372_p2 = scmp.lt.s32.totalorder %s366_s4, %s366_s4 }
   0xc   :  { %96 = vperm.xlu0 %364, %v93_v9  }
   0xd   :  { %p373_p3 = por %p372_p2, %p371_p1 }
   0xf   :  { %p374_p4 = pnand %p373_p3, %p367_p0 }
  0x83   :  { %v42_v11 = vpop.permute.xlu0 %41 }
  0x86   :  { %v305_v27 = vpop.permute.xlu1 %304 }
  0x87   :  { %v97_v12 = vpop.permute.xlu0 %96 }
  0xc6   :  { %v86_v13 = vpop.f32.mrf.mxu0 }
  0xc7   :  { %v139_v14 = vpop.f32.mrf.mxu1  ;;  %v87_v15 = vadd.f32 %v86_v13, %v42_v11 }
  0xc8   :  { %v140_v16 = vadd.f32 %v139_v14, %v97_v12  ;;  %v342_v17 = vpop.f32.mrf.mxu0 }
  0xc9   :  { %v348_v18 = vpop.f32.mrf.mxu1  ;;  %v92_v19 = vmax.f32 %v87_v15, 0.0 }
  0xca   :  { %v145_v20 = vmax.f32 %v140_v16, 0.0  ;;  %v89_v23 = vpop.f32.mrf.mxu0 }
  0xcb   :  { %v142_v24 = vpop.f32.mrf.mxu1  ;;  %356 = vmatpush3.msk.msra.mxu1 %vm48_vm0, %v92_v19 }
  0xcc   :  { %351 = vmatpush3.msk.msra.mxu0 %vm48_vm0, %v145_v20  ;;  %v343_v25 = vpop.f32.mrf.mxu0  ;;  %358 = vmatmul.mubr.msk.f32.vlgmr.msra.gmra.mxu1 %vm148_vm3, %v146_v22 }
  0xcd   :  { %v349_v26 = vpop.f32.mrf.mxu1  ;;  %353 = vmatmul.mubr.msk.f32.vlgmr.msra.gmra.mxu0 %vm148_vm3, %v147_v21 }
 0x18c   :  { %v297_v29 = vpop.f32.mrf.mxu1 }
 0x18d   :  { %v221_v28 = vpop.f32.mrf.mxu0 }
 0x18e   :  { %v298_v30 = vadd.f32 %v297_v29, %v221_v28  ;;  %v359_v32 = vpop.f32.mrf.mxu1 }
 0x18f   :  { %v354_v31 = vpop.f32.mrf.mxu0 }
 0x190   :  { %v307_v33 = vadd.f32 %v305_v27, %v298_v30 }
 0x192   :  { %v308_v34 = vmax.f32 %v307_v33, 0.0 }
 0x194   :  { %309 = vst [vmem:[#allocation2] sm:$0xff] %v308_v34 }
 0x195   :  { %377 = shalt.err (!%p374_p4)
}
 0x196   :  { %319 = dma.vmem_to_hbm [thread:$0]  %s317_s8, 128, %s485_s9, [#allocation3]  }
 0x197   :  { %386 = dma.done.wait [#allocation3], 128  }
 0x198   :  { %387 = vsyncadd [#allocation3], 4294967168 }
 0x199   :  { %323 = vsyncpa [#allocation3], 1 }

</bundles_post_ra>
